<compile_context>
chip_gen: v6e
topology: v6e:2x2x1
jax: 0.10.0
libtpu: 0.0.40
codegen_flags: <defaults>
</compile_context>

<pallas_src>
import functools

import jax
import jax.numpy as jnp
from jax.experimental import pallas as pl
from jax.experimental.pallas import tpu as pltpu


def _round_up(a: int, b: int) -> int:
    return (a + b - 1) // b * b


def _cdiv(a: int, b: int) -> int:
    return (a + b - 1) // b


def _scale_mul_kernel(s_ref, x_ref, o_ref, *, tr: int):
    # s_ref: (rows_p, 1)  -- whole scale vector, resident in VMEM for all steps
    # x_ref: (tr, tc)     -- current input block
    # o_ref: (tr, tc)     -- current output block
    i = pl.program_id(0)                       # row-tile index
    r0 = pl.multiple_of(i * tr, tr)            # aligned sublane offset hint
    s = s_ref[pl.ds(r0, tr), :]                # (tr, 1) slice of resident scale
    o_ref[...] = x_ref[...] * s                # lane-broadcast multiply (VPU)


def channelwise_mul(x, scale, *, target_block_bytes=2 << 20):
    """Computes x * scale with PyTorch (N,C,H,W) * (1,C,1,1) broadcasting."""
    N, C, H, W = x.shape
    rows, cols = N * C, H * W
    dtype = x.dtype
    itemsize = jnp.dtype(dtype).itemsize

    # dtype-aware sublane packing: 8 rows/vreg f32, 16 bf16, 32 int8/fp8.
    sub = max(8, 32 // itemsize)
    LANE = 128

    x2 = x.reshape(rows, cols)
    s2 = jnp.broadcast_to(scale, (N, C, 1, 1)).reshape(rows, 1).astype(dtype)

    # ---- lane (last-dim) tile: big and lane-dense (multiple of 128) ----
    cols128 = _round_up(cols, LANE)
    # widest lane tile such that even a minimal-height block stays in budget
    max_tc = max(LANE, (target_block_bytes // (sub * itemsize)) // LANE * LANE)
    if cols128 <= max_tc:
        tc = cols128                      # single lane tile, minimal padding
    else:
        tc = min(max_tc, 8192)            # large lane-dense tile, tile over cols
    cols_p = _round_up(cols, tc)

    # ---- row (sublane) tile: fill the per-block budget ----
    tr = max(sub, (target_block_bytes // (tc * itemsize)) // sub * sub)
    rows_sub = _round_up(rows, sub)
    if rows_sub * tc * itemsize <= (target_block_bytes * 3) // 2:
        tr = rows_sub                     # whole row extent fits in one tile
    else:
        # balance row tiles to minimize padding (tr stays <= budget, mult of sub)
        n_tiles = _cdiv(rows_sub, tr)
        tr = _round_up(_cdiv(rows_sub, n_tiles), sub)
    rows_p = _round_up(rows, tr)

    # ---- pad to tile multiples (no-op when already aligned) ----
    if (rows_p, cols_p) != (rows, cols):
        x2 = jnp.pad(x2, ((0, rows_p - rows), (0, cols_p - cols)))
    if rows_p != rows:
        s2 = jnp.pad(s2, ((0, rows_p - rows), (0, 0)))

    grid = (rows_p // tr, cols_p // tc)

    out = pl.pallas_call(
        functools.partial(_scale_mul_kernel, tr=tr),
        out_shape=jax.ShapeDtypeStruct((rows_p, cols_p), dtype),
        grid_spec=pltpu.PrefetchScalarGridSpec(
            num_scalar_prefetch=0,
            grid=grid,
            in_specs=[
                # whole scale vector fetched once, resident across the grid
                pl.BlockSpec((rows_p, 1), lambda i, j: (0, 0)),
                pl.BlockSpec((tr, tc), lambda i, j: (i, j)),
            ],
            out_specs=pl.BlockSpec((tr, tc), lambda i, j: (i, j)),
        ),
        compiler_params=pltpu.CompilerParams(
            dimension_semantics=("parallel", "parallel"),
        ),
    )(s2, x2)

    if (rows_p, cols_p) != (rows, cols):
        out = out[:rows, :cols]
    return out.reshape(N, C, H, W)


if __name__ == "__main__":
    key = jax.random.PRNGKey(0)
    k1, k2, k3, k4 = jax.random.split(key, 4)

    # Small stand-ins for the module's (1,192,56,56) * (1,192,1,1) multiply.
    # Case A: lane-aligned spatial size (H*W multiple of 128).
    xa = jax.random.normal(k1, (2, 8, 16, 16), dtype=jnp.float32)
    sa = jax.random.normal(k2, (1, 8, 1, 1), dtype=jnp.float32)
    # Case B: ragged spatial size (like 56*56 in the real module) -> padding path.
    xb = jax.random.normal(k3, (1, 16, 12, 12), dtype=jnp.float32)
    sb = jax.random.normal(k4, (1, 16, 1, 1), dtype=jnp.float32)

    oa = jax.block_until_ready(channelwise_mul(xa, sa))
    ob = jax.block_until_ready(channelwise_mul(xb, sb))

    assert oa.shape == xa.shape and ob.shape == xb.shape
    assert jnp.allclose(oa, xa * sa, atol=1e-6, rtol=1e-6)
    assert jnp.allclose(ob, xb * sb, atol=1e-6, rtol=1e-6)

    print("KERNEL_OK")
</pallas_src>

<mosaic_0001>
module attributes {stable_mosaic.version = 11 : i64} {
  func.func @_scale_mul_kernel(%arg0: i32, %arg1: i32, %arg2: memref<16x1xf32, #tpu.memory_space<vmem>>, %arg3: memref<16x256xf32, #tpu.memory_space<vmem>>, %arg4: memref<16x256xf32, #tpu.memory_space<vmem>>) attributes {dimension_semantics = [#tpu.dimension_semantics<parallel>, #tpu.dimension_semantics<parallel>], iteration_bounds = array<i64: 1, 1>, scalar_prefetch = 0 : i64, scratch_operands = 0 : i64, tpu.core_type = #tpu.core_type<tc>, window_params = [{pipeline_mode = #tpu.pipeline_mode<synchronous>, transform_indices = @transform_0, window_bounds = array<i64: 16, 1>}, {transform_indices = @transform_1, window_bounds = array<i64: 16, 256>}, {transform_indices = @transform_2, window_bounds = array<i64: 16, 256>}]} {
    %c16_i32 = arith.constant 16 : i32
    %0 = arith.muli %arg0, %c16_i32 : i32
    %1 = tpu.assume_multiple %0, 16 : i32
    %2 = arith.index_cast %1 : i32 to index
    %c0 = arith.constant 0 : index
    %3 = vector.load %arg2[%2, %c0] : memref<16x1xf32, #tpu.memory_space<vmem>>, vector<16x1xf32>
    %c0_0 = arith.constant 0 : index
    %c0_1 = arith.constant 0 : index
    %4 = vector.load %arg3[%c0_0, %c0_1] : memref<16x256xf32, #tpu.memory_space<vmem>>, vector<16x256xf32>
    %5 = vector.broadcast %3 : vector<16x1xf32> to vector<16x256xf32>
    %6 = arith.mulf %4, %5 : vector<16x256xf32>
    %c0_2 = arith.constant 0 : index
    %c0_3 = arith.constant 0 : index
    %7 = vector.load %arg4[%c0_2, %c0_3] : memref<16x256xf32, #tpu.memory_space<vmem>>, vector<16x256xf32>
    tpu.vector_store %arg4[%c0_2, %c0_3], %6 {strides = array<i32>} : memref<16x256xf32, #tpu.memory_space<vmem>>, vector<16x256xf32>,
    return
  }
  func.func @transform_0(%arg0: i32, %arg1: i32) -> (i32, i32) {
    %c0_i32 = arith.constant 0 : i32
    %c0_i32_0 = arith.constant 0 : i32
    %c0_i32_1 = arith.constant 0 : i32
    return %c0_i32, %c0_i32_0 : i32, i32
  }
  func.func @transform_1(%arg0: i32, %arg1: i32) -> (i32, i32) {
    %c0_i32 = arith.constant 0 : i32
    return %arg0, %arg1 : i32, i32
  }
  func.func @transform_2(%arg0: i32, %arg1: i32) -> (i32, i32) {
    %c0_i32 = arith.constant 0 : i32
    return %arg0, %arg1 : i32, i32
  }
}

</mosaic_0001>

<bundles_post_ra>
// kernel: tpu_custom_call.1
= control target key start
LH: loop header
LB: loop body
LE: loop exit
PB: predicated region body
PF: predicated region fallthrough
CT: control target
= control target key end

     0   :  { %7 = vsyncpa [#allocation3], 0  ;;  %s157_s0 = inlined_call_operand.vmem [shape: f32[16,1], index: 0, kind: input, shape index: {}]   ;;  %s158_s1 = inlined_call_operand.hbm [shape: f32[16,256], index: 1, kind: input, shape index: {}]   ;;  %s159_s2 = inlined_call_operand.hbm [shape: f32[16,256], index: 2, kind: output, shape index: {}]  }
   0x1   :  { %8 = vsyncpa [#allocation4], 0  ;;  %s119_s9 = smov [#allocation2]  }
   0x2   :  { %s16_s10 = sshll.u32 %s119_s9, 4  ;;  %s17_s10 = int_to_ptr.vmem [resolvable:$true] %s16_s10 }
   0x3   :  { %s83_s11 = scalar_lea.vmem %s17_s10, 512  ;;  %p88_p1 = scmp.lt.s32.totalorder %s17_s10, %s17_s10 }
   0x4   :  { %p84_p0 = scmp.ne.s32.totalorder %s17_s10, %s83_s11  ;;  %p89_p2 = scmp.lt.s32.totalorder %s83_s11, %s83_s11 }
   0x6   :  { %p90_p3 = por %p89_p2, %p88_p1 }
   0x8   :  { %p91_p4 = pnand %p90_p3, %p84_p0 }
   0xa   :  { %94 = shalt.err (!%p91_p4)
}
   0xb   :  { %s120_s12 = smov 256   ;;  %s121_s13 = smov 16  }
   0xc   :  { %22 = dma.hbm_to_vmem [thread:$0]  %s158_s1, 512, %s17_s10, [#allocation3], %s120_s12, %s120_s12, %s121_s13  }
   0xd   :  { %115 = dma.done.wait [#allocation3], 512  }
   0xe   :  { %116 = vsyncadd [#allocation3], 4294966784  ;;  %v122_v0 = vmov 0   ;;  %v28_v1 = vld [vmem:[%s157_s0] sm:$0xff]  ;;  %v29_v2 = vld [vmem:[%s157_s0 + $0x8] sm:$0xff]  ;;  %s123_s1 = smov [#allocation5]  }
   0xf   :  { %74 = vset.pattern.permute.xlu0 %v122_v0  ;;  %v30_v3 = vld [vmem:[#allocation2] sm:$0xff]  ;;  %v31_v4 = vld [vmem:[#allocation2 + $0x8] sm:$0xff]  ;;  %v32_v8 = vld [vmem:[#allocation2 + $0x10] sm:$0xff]  ;;  %s57_s20 = sshll.u32 %s123_s1, 4  ;;  %s58_s20 = int_to_ptr.vmem [resolvable:$true] %s57_s20 }
  0x10   :  { %36 = vperm.xlu0 %74, %v28_v1   ;;  %v33_v9 = vld [vmem:[#allocation2 + $0x18] sm:$0xff]  ;;  %s95_s21 = scalar_lea.vmem %s58_s20, 512  ;;  %p100_p6 = scmp.lt.s32.totalorder %s58_s20, %s58_s20 }
  0x11   :  { %p96_p5 = scmp.ne.s32.totalorder %s58_s20, %s95_s21  ;;  %p101_p7 = scmp.lt.s32.totalorder %s95_s21, %s95_s21 }
  0x13   :  { %p102_p8 = por %p101_p7, %p100_p6 }
  0x14   :  { %41 = vperm.xlu0 %74, %v29_v2  }
  0x15   :  { %p103_p9 = pnand %p102_p8, %p96_p5 }
  0x8b   :  { %v37_v5 = vpop.permute.xlu0 %36 }
  0x8c   :  { %v44_v6 = vmul.f32 %v37_v5, %v30_v3  ;;  %v45_v7 = vmul.f32 %v37_v5, %v31_v4 }
  0x8e   :  { %48 = vst [vmem:[#allocation5] sm:$0xff] %v44_v6  ;;  %49 = vst [vmem:[#allocation5 + $0x8] sm:$0xff] %v45_v7 }
  0x8f   :  { %v42_v10 = vpop.permute.xlu0 %41 }
  0x90   :  { %v46_v11 = vmul.f32 %v42_v10, %v32_v8  ;;  %v47_v12 = vmul.f32 %v42_v10, %v33_v9 }
  0x92   :  { %50 = vst [vmem:[#allocation5 + $0x10] sm:$0xff] %v46_v11  ;;  %51 = vst [vmem:[#allocation5 + $0x18] sm:$0xff] %v47_v12 }
  0x93   :  { %106 = shalt.err (!%p103_p9)
}
  0x94   :  { %63 = dma.vmem_to_hbm [thread:$0]  %s58_s20, 512, %s159_s2, [#allocation4], %s120_s12, %s120_s12, %s121_s13  }
  0x95   :  { %117 = dma.done.wait [#allocation4], 512  }
  0x96   :  { %118 = vsyncadd [#allocation4], 4294966784 }
  0x97   :  { %67 = vsyncpa [#allocation3], 1 }
  0x98   :  { %68 = vsyncpa [#allocation4], 1 }

</bundles_post_ra>
